<compile_context>
chip_gen: v6e
topology: v6e:2x2x1
jax: 0.10.0
libtpu: 0.0.40
codegen_flags: <defaults>
</compile_context>

<pallas_src>
import jax
import jax.numpy as jnp
from jax.experimental import pallas as pl
from jax.experimental.pallas import tpu as pltpu

_NEG = jnp.float32(-1e30)  # finite "-inf" for padded class columns (avoids NaN math)


def chatbot_mlp_kernel(x_ref, w1_ref, b1_ref, w2_ref, b2_ref, w3_ref, b3_ref, o_ref):
    # fc1 + ReLU  (bf16 MXU operands, f32 accumulate / epilogue)
    x = x_ref[...].astype(jnp.bfloat16)
    h1 = jnp.dot(x, w1_ref[...], preferred_element_type=jnp.float32)
    h1 = jnp.maximum(h1 + b1_ref[...], 0.0)

    # fc2 + ReLU
    h2 = jnp.dot(h1.astype(jnp.bfloat16), w2_ref[...],
                 preferred_element_type=jnp.float32)
    h2 = jnp.maximum(h2 + b2_ref[...], 0.0)

    # fc3 (class dim padded to a lane-dense multiple of 128; padded bias = -1e30)
    logits = jnp.dot(h2.astype(jnp.bfloat16), w3_ref[...],
                     preferred_element_type=jnp.float32)
    logits = logits + b3_ref[...]

    # LogSoftmax along dim=1. Padded columns sit at ~-1e30, so exp() underflows to 0
    # and they perturb neither the max nor the log-sum-exp.
    m = jnp.max(logits, axis=-1, keepdims=True)
    shifted = logits - m
    lse = jnp.log(jnp.sum(jnp.exp(shifted), axis=-1, keepdims=True))
    o_ref[...] = (shifted - lse).astype(o_ref.dtype)


def prepare_params(params):
    """One-time conversion of PyTorch-layout params (W: [out,in], b: [out]):
    transpose W to [in,out] and cast to bf16, reshape b to [1,out] f32, and pad the
    fc3 class dim to a multiple of 128 for a lane-dense output store."""
    w1, b1 = params["fc1"]
    w2, b2 = params["fc2"]
    w3, b3 = params["fc3"]

    out_size = w3.shape[0]
    out_pad = ((out_size + 127) // 128) * 128
    pad = out_pad - out_size

    w3_t = jnp.pad(w3.T.astype(jnp.float32), ((0, 0), (0, pad)))
    b3_r = jnp.pad(b3.reshape(1, -1).astype(jnp.float32), ((0, 0), (0, pad)),
                   constant_values=_NEG)

    return {
        "w1": w1.T.astype(jnp.bfloat16),
        "b1": b1.reshape(1, -1).astype(jnp.float32),
        "w2": w2.T.astype(jnp.bfloat16),
        "b2": b2.reshape(1, -1).astype(jnp.float32),
        "w3": w3_t.astype(jnp.bfloat16),
        "b3": b3_r,
        "out_size": out_size,
    }


def _default_batch_tile():
    # v5e/v6e: 128 MiB VMEM -> TM=512; v7x: 64 MiB -> TM=256. The weight set here is
    # tiny (hidden=128, ~0.1 MB), so either tile is far below the scoped VMEM limit.
    try:
        vmem = pltpu.get_tpu_info().vmem_capacity_bytes
        return 256 if vmem <= 64 * 1024 * 1024 else 512
    except Exception:
        return 256


def chatbot_model(x, prep, *, tm=None):
    """x: [B, input_size] float32. prep: output of prepare_params()."""
    B, in_size = x.shape
    hidden = prep["w1"].shape[1]
    out_pad = prep["w3"].shape[1]
    out_size = prep["out_size"]

    if tm is None:
        tm = _default_batch_tile()
    # Never use a tile larger than the (8-aligned) batch itself.
    tm = min(tm, max(8, ((B + 7) // 8) * 8))
    b_pad = ((B + tm - 1) // tm) * tm
    if b_pad != B:
        x = jnp.pad(x, ((0, b_pad - B), (0, 0)))

    grid = (b_pad // tm,)

    flops = 2 * b_pad * (in_size * hidden + hidden * hidden + hidden * out_pad)
    bytes_accessed = (
        b_pad * in_size * 4                                              # x (f32)
        + 2 * (in_size * hidden + hidden * hidden + hidden * out_pad)    # bf16 weights
        + 4 * (2 * hidden + out_pad)                                     # f32 biases
        + b_pad * out_pad * 4)                                           # out (f32)

    out = pl.pallas_call(
        chatbot_mlp_kernel,
        out_shape=jax.ShapeDtypeStruct((b_pad, out_pad), jnp.float32),
        grid=grid,
        in_specs=[
            pl.BlockSpec((tm, in_size), lambda i: (i, 0)),       # x: batch-tiled
            pl.BlockSpec((in_size, hidden), lambda i: (0, 0)),   # weights / biases:
            pl.BlockSpec((1, hidden), lambda i: (0, 0)),         #   VMEM-resident,
            pl.BlockSpec((hidden, hidden), lambda i: (0, 0)),    #   DMA'd exactly once
            pl.BlockSpec((1, hidden), lambda i: (0, 0)),
            pl.BlockSpec((hidden, out_pad), lambda i: (0, 0)),
            pl.BlockSpec((1, out_pad), lambda i: (0, 0)),
        ],
        out_specs=pl.BlockSpec((tm, out_pad), lambda i: (i, 0)),
        compiler_params=pltpu.CompilerParams(
            dimension_semantics=("parallel",)),
        cost_estimate=pl.CostEstimate(
            flops=flops,
            transcendentals=b_pad * out_pad,
            bytes_accessed=bytes_accessed),
    )(x, prep["w1"], prep["b1"], prep["w2"], prep["b2"], prep["w3"], prep["b3"])

    # Drop batch padding and the lane-dense class padding.
    return out[:B, :out_size]


def init_params(key, input_size, hidden_size, output_size):
    """Deterministic init mimicking nn.Linear default (U(-1/sqrt(fan_in), +))."""
    def linear(key, fan_in, fan_out):
        kw, kb = jax.random.split(key)
        bound = 1.0 / jnp.sqrt(jnp.float32(fan_in))
        w = jax.random.uniform(kw, (fan_out, fan_in), jnp.float32, -bound, bound)
        b = jax.random.uniform(kb, (fan_out,), jnp.float32, -bound, bound)
        return w, b

    k1, k2, k3 = jax.random.split(key, 3)
    return {
        "fc1": linear(k1, input_size, hidden_size),
        "fc2": linear(k2, hidden_size, hidden_size),
        "fc3": linear(k3, hidden_size, output_size),
    }


if __name__ == "__main__":
    # Small shapes consistent with the module's forward (bag-of-words -> intents).
    batch = 8
    input_size = 32
    hidden_size = 128
    output_size = 16

    key = jax.random.PRNGKey(0)
    kx, kp = jax.random.split(key)

    x = jax.random.uniform(kx, (batch, input_size), jnp.float32, 0.0, 1.0)
    params = init_params(kp, input_size, hidden_size, output_size)
    prep = prepare_params(params)   # one-time weight transpose / bf16 cast / pad

    out = chatbot_model(x, prep)
    out = jax.block_until_ready(out)

    # Pure-JAX reference with the same bf16-operand / f32-accumulate matmul policy.
    def ref(x, params):
        def layer(h, w, b):
            return jnp.dot(h.astype(jnp.bfloat16), w.T.astype(jnp.bfloat16),
                           preferred_element_type=jnp.float32) + b
        h = jnp.maximum(layer(x, *params["fc1"]), 0.0)
        h = jnp.maximum(layer(h, *params["fc2"]), 0.0)
        logits = layer(h, *params["fc3"])
        return jax.nn.log_softmax(logits, axis=1)

    r = ref(x, params)
    assert out.shape == (batch, output_size)
    assert bool(jnp.all(jnp.isfinite(out)))
    assert jnp.allclose(out, r, atol=1e-3, rtol=1e-3)

    print("KERNEL_OK")
</pallas_src>

<mosaic_0001>
module attributes {stable_mosaic.version = 11 : i64} {
  func.func @chatbot_mlp_kernel(%arg0: i32, %arg1: memref<8x32xf32, #tpu.memory_space<vmem>>, %arg2: memref<32x128xbf16, #tpu.memory_space<vmem>>, %arg3: memref<1x128xf32, #tpu.memory_space<vmem>>, %arg4: memref<128x128xbf16, #tpu.memory_space<vmem>>, %arg5: memref<1x128xf32, #tpu.memory_space<vmem>>, %arg6: memref<128x128xbf16, #tpu.memory_space<vmem>>, %arg7: memref<1x128xf32, #tpu.memory_space<vmem>>, %arg8: memref<8x128xf32, #tpu.memory_space<vmem>>) attributes {dimension_semantics = [#tpu.dimension_semantics<parallel>], iteration_bounds = array<i64: 1>, scalar_prefetch = 0 : i64, scratch_operands = 0 : i64, tpu.core_type = #tpu.core_type<tc>, window_params = [{transform_indices = @transform_0, window_bounds = array<i64: 8, 32>}, {pipeline_mode = #tpu.pipeline_mode<synchronous>, transform_indices = @transform_1, window_bounds = array<i64: 32, 128>}, {pipeline_mode = #tpu.pipeline_mode<synchronous>, transform_indices = @transform_2, window_bounds = array<i64: 1, 128>}, {pipeline_mode = #tpu.pipeline_mode<synchronous>, transform_indices = @transform_3, window_bounds = array<i64: 128, 128>}, {pipeline_mode = #tpu.pipeline_mode<synchronous>, transform_indices = @transform_4, window_bounds = array<i64: 1, 128>}, {pipeline_mode = #tpu.pipeline_mode<synchronous>, transform_indices = @transform_5, window_bounds = array<i64: 128, 128>}, {pipeline_mode = #tpu.pipeline_mode<synchronous>, transform_indices = @transform_6, window_bounds = array<i64: 1, 128>}, {transform_indices = @transform_7, window_bounds = array<i64: 8, 128>}]} {
    %c0 = arith.constant 0 : index
    %c0_0 = arith.constant 0 : index
    %0 = vector.load %arg1[%c0, %c0_0] : memref<8x32xf32, #tpu.memory_space<vmem>>, vector<8x32xf32>
    %1 = arith.truncf %0 : vector<8x32xf32> to vector<8x32xbf16>
    %c0_1 = arith.constant 0 : index
    %c0_2 = arith.constant 0 : index
    %2 = vector.load %arg2[%c0_1, %c0_2] : memref<32x128xbf16, #tpu.memory_space<vmem>>, vector<32x128xbf16>
    %cst = arith.constant dense<0.000000e+00> : vector<8x128xf32>
    %3 = tpu.matmul %1, %2, %cst {dimension_numbers = #tpu.dot_dimension_numbers<[1], [0], [0], [1], [0, 0, 1, 1], [], []>} : vector<8x32xbf16>, vector<32x128xbf16>, vector<8x128xf32> -> vector<8x128xf32>
    %c0_3 = arith.constant 0 : index
    %c0_4 = arith.constant 0 : index
    %4 = vector.load %arg3[%c0_3, %c0_4] : memref<1x128xf32, #tpu.memory_space<vmem>>, vector<1x128xf32>
    %5 = vector.broadcast %4 : vector<1x128xf32> to vector<8x128xf32>
    %6 = arith.addf %3, %5 : vector<8x128xf32>
    %cst_5 = arith.constant 0.000000e+00 : f32
    %7 = vector.broadcast %cst_5 : f32 to vector<8x128xf32>
    %8 = arith.maximumf %6, %7 : vector<8x128xf32>
    %9 = arith.truncf %8 : vector<8x128xf32> to vector<8x128xbf16>
    %c0_6 = arith.constant 0 : index
    %c0_7 = arith.constant 0 : index
    %10 = vector.load %arg4[%c0_6, %c0_7] : memref<128x128xbf16, #tpu.memory_space<vmem>>, vector<128x128xbf16>
    %cst_8 = arith.constant dense<0.000000e+00> : vector<8x128xf32>
    %11 = tpu.matmul %9, %10, %cst_8 {dimension_numbers = #tpu.dot_dimension_numbers<[1], [0], [0], [1], [0, 0, 1, 1], [], []>} : vector<8x128xbf16>, vector<128x128xbf16>, vector<8x128xf32> -> vector<8x128xf32>
    %c0_9 = arith.constant 0 : index
    %c0_10 = arith.constant 0 : index
    %12 = vector.load %arg5[%c0_9, %c0_10] : memref<1x128xf32, #tpu.memory_space<vmem>>, vector<1x128xf32>
    %13 = vector.broadcast %12 : vector<1x128xf32> to vector<8x128xf32>
    %14 = arith.addf %11, %13 : vector<8x128xf32>
    %cst_11 = arith.constant 0.000000e+00 : f32
    %15 = vector.broadcast %cst_11 : f32 to vector<8x128xf32>
    %16 = arith.maximumf %14, %15 : vector<8x128xf32>
    %17 = arith.truncf %16 : vector<8x128xf32> to vector<8x128xbf16>
    %c0_12 = arith.constant 0 : index
    %c0_13 = arith.constant 0 : index
    %18 = vector.load %arg6[%c0_12, %c0_13] : memref<128x128xbf16, #tpu.memory_space<vmem>>, vector<128x128xbf16>
    %cst_14 = arith.constant dense<0.000000e+00> : vector<8x128xf32>
    %19 = tpu.matmul %17, %18, %cst_14 {dimension_numbers = #tpu.dot_dimension_numbers<[1], [0], [0], [1], [0, 0, 1, 1], [], []>} : vector<8x128xbf16>, vector<128x128xbf16>, vector<8x128xf32> -> vector<8x128xf32>
    %c0_15 = arith.constant 0 : index
    %c0_16 = arith.constant 0 : index
    %20 = vector.load %arg7[%c0_15, %c0_16] : memref<1x128xf32, #tpu.memory_space<vmem>>, vector<1x128xf32>
    %21 = vector.broadcast %20 : vector<1x128xf32> to vector<8x128xf32>
    %22 = arith.addf %19, %21 : vector<8x128xf32>
    %cst_17 = arith.constant dense<0xFF800000> : vector<8xf32>
    %23 = vector.multi_reduction <maximumf>, %22, %cst_17 [1] : vector<8x128xf32> to vector<8xf32>
    %24 = vector.shape_cast %23 : vector<8xf32> to vector<8x1xf32>
    %25 = vector.broadcast %24 : vector<8x1xf32> to vector<8x128xf32>
    %26 = arith.subf %22, %25 : vector<8x128xf32>
    %27 = math.exp %26 : vector<8x128xf32>
    %cst_18 = arith.constant dense<0.000000e+00> : vector<8xf32>
    %28 = vector.multi_reduction <add>, %27, %cst_18 [1] : vector<8x128xf32> to vector<8xf32>
    %29 = vector.shape_cast %28 : vector<8xf32> to vector<8x1xf32>
    %30 = math.log %29 : vector<8x1xf32>
    %31 = vector.broadcast %30 : vector<8x1xf32> to vector<8x128xf32>
    %32 = arith.subf %26, %31 : vector<8x128xf32>
    %c0_19 = arith.constant 0 : index
    %c0_20 = arith.constant 0 : index
    %33 = vector.load %arg8[%c0_19, %c0_20] : memref<8x128xf32, #tpu.memory_space<vmem>>, vector<8x128xf32>
    tpu.vector_store %arg8[%c0_19, %c0_20], %32 {strides = array<i32>} : memref<8x128xf32, #tpu.memory_space<vmem>>, vector<8x128xf32>,
    return
  }
  func.func @transform_0(%arg0: i32) -> (i32, i32) {
    %c0_i32 = arith.constant 0 : i32
    %c0_i32_0 = arith.constant 0 : i32
    return %arg0, %c0_i32 : i32, i32
  }
  func.func @transform_1(%arg0: i32) -> (i32, i32) {
    %c0_i32 = arith.constant 0 : i32
    %c0_i32_0 = arith.constant 0 : i32
    %c0_i32_1 = arith.constant 0 : i32
    return %c0_i32, %c0_i32_0 : i32, i32
  }
  func.func @transform_2(%arg0: i32) -> (i32, i32) {
    %c0_i32 = arith.constant 0 : i32
    %c0_i32_0 = arith.constant 0 : i32
    %c0_i32_1 = arith.constant 0 : i32
    return %c0_i32, %c0_i32_0 : i32, i32
  }
  func.func @transform_3(%arg0: i32) -> (i32, i32) {
    %c0_i32 = arith.constant 0 : i32
    %c0_i32_0 = arith.constant 0 : i32
    %c0_i32_1 = arith.constant 0 : i32
    return %c0_i32, %c0_i32_0 : i32, i32
  }
  func.func @transform_4(%arg0: i32) -> (i32, i32) {
    %c0_i32 = arith.constant 0 : i32
    %c0_i32_0 = arith.constant 0 : i32
    %c0_i32_1 = arith.constant 0 : i32
    return %c0_i32, %c0_i32_0 : i32, i32
  }
  func.func @transform_5(%arg0: i32) -> (i32, i32) {
    %c0_i32 = arith.constant 0 : i32
    %c0_i32_0 = arith.constant 0 : i32
    %c0_i32_1 = arith.constant 0 : i32
    return %c0_i32, %c0_i32_0 : i32, i32
  }
  func.func @transform_6(%arg0: i32) -> (i32, i32) {
    %c0_i32 = arith.constant 0 : i32
    %c0_i32_0 = arith.constant 0 : i32
    %c0_i32_1 = arith.constant 0 : i32
    return %c0_i32, %c0_i32_0 : i32, i32
  }
  func.func @transform_7(%arg0: i32) -> (i32, i32) {
    %c0_i32 = arith.constant 0 : i32
    %c0_i32_0 = arith.constant 0 : i32
    return %arg0, %c0_i32 : i32, i32
  }
}

</mosaic_0001>

<bundles_post_ra>
// kernel: tpu_custom_call.1
= control target key start
LH: loop header
LB: loop body
LE: loop exit
PB: predicated region body
PF: predicated region fallthrough
CT: control target
= control target key end

     0   :  { %12 = vsyncpa [#allocation3], 0  ;;  %s740_s0 = inlined_call_operand.hbm [shape: f32[8,32], index: 0, kind: input, shape index: {}]   ;;  %s741_s1 = inlined_call_operand.hbm [shape: bf16[32,128], index: 1, kind: input, shape index: {}]   ;;  %s742_s2 = inlined_call_operand.vmem [shape: f32[1,128], index: 2, kind: input, shape index: {}]   ;;  %s743_s3 = inlined_call_operand.hbm [shape: bf16[128,128], index: 3, kind: input, shape index: {}]   ;;  %s744_s4 = inlined_call_operand.vmem [shape: f32[1,128], index: 4, kind: input, shape index: {}]   ;;  %s745_s5 = inlined_call_operand.hbm [shape: bf16[128,128], index: 5, kind: input, shape index: {}]   ;;  %s746_s6 = inlined_call_operand.vmem [shape: f32[1,128], index: 6, kind: input, shape index: {}]   ;;  %s747_s7 = inlined_call_operand.hbm [shape: f32[8,128], index: 7, kind: output, shape index: {}]  }
   0x1   :  { %13 = vsyncpa [#allocation6], 0 }
   0x2   :  { %14 = vsyncpa [#allocation9], 0 }
   0x3   :  { %15 = vsyncpa [#allocation4], 0  ;;  %s634_s24 = smov [#allocation5]  }
   0x4   :  { %s31_s25 = sshll.u32 %s634_s24, 4  ;;  %s32_s25 = int_to_ptr.vmem [resolvable:$true] %s31_s25 }
   0x5   :  { %s534_s26 = scalar_lea.vmem %s32_s25, 256  ;;  %p539_p1 = scmp.lt.s32.totalorder %s32_s25, %s32_s25 }
   0x6   :  { %p535_p0 = scmp.ne.s32.totalorder %s32_s25, %s534_s26  ;;  %p540_p2 = scmp.lt.s32.totalorder %s534_s26, %s534_s26 }
   0x8   :  { %p541_p3 = por %p540_p2, %p539_p1 }
   0xa   :  { %p542_p4 = pnand %p541_p3, %p535_p0 }
   0xc   :  { %545 = shalt.err (!%p542_p4)
}
   0xd   :  { %s635_s27 = smov 64   ;;  %s636_s28 = smov 4  }
   0xe   :  { %37 = dma.hbm_to_vmem [thread:$0]  %s741_s1, 256, %s32_s25, [#allocation6], %s635_s27, %s635_s27, %s636_s28  }
   0xf   :  { %s637_s8 = smov [#allocation2]   ;;  %s638_s10 = smov [#allocation7]  }
  0x10   :  { %s22_s9 = sshll.u32 %s637_s8, 4  ;;  %s45_s11 = sshll.u32 %s638_s10, 4  ;;  %s23_s9 = int_to_ptr.vmem [resolvable:$true] %s22_s9  ;;  %s46_s11 = int_to_ptr.vmem [resolvable:$true] %s45_s11 }
  0x11   :  { %s554_s12 = scalar_lea.vmem %s23_s9, 128  ;;  %p559_p6 = scmp.lt.s32.totalorder %s23_s9, %s23_s9 }
  0x12   :  { %p555_p5 = scmp.ne.s32.totalorder %s23_s9, %s554_s12  ;;  %p560_p7 = scmp.lt.s32.totalorder %s554_s12, %s554_s12 }
  0x14   :  { %p561_p8 = por %p560_p7, %p559_p6 }
  0x16   :  { %p562_p9 = pnand %p561_p8, %p555_p5 }
  0x18   :  { %565 = shalt.err (!%p562_p9)
}
  0x19   :  { %25 = dma.hbm_to_vmem [thread:$0]  %s740_s0, 128, %s23_s9, [#allocation3]  }
  0x1a   :  { %s574_s15 = scalar_lea.vmem %s46_s11, 1024  ;;  %p579_p11 = scmp.lt.s32.totalorder %s46_s11, %s46_s11 }
  0x1b   :  { %p575_p10 = scmp.ne.s32.totalorder %s46_s11, %s574_s15  ;;  %p580_p12 = scmp.lt.s32.totalorder %s574_s15, %s574_s15 }
  0x1d   :  { %p581_p13 = por %p580_p12, %p579_p11 }
  0x1f   :  { %p582_p0 = pnand %p581_p13, %p575_p10 }
  0x21   :  { %585 = shalt.err (!%p582_p0)
}
  0x22   :  { %51 = dma.hbm_to_vmem [thread:$0]  %s743_s3, 1024, %s46_s11, [#allocation6], %s635_s27, %s635_s27, %s636_s28  }
  0x23   :  { %s639_s17 = smov [#allocation8]  }
  0x24   :  { %s59_s18 = sshll.u32 %s639_s17, 4  ;;  %s60_s18 = int_to_ptr.vmem [resolvable:$true] %s59_s18 }
  0x25   :  { %s594_s19 = scalar_lea.vmem %s60_s18, 1024  ;;  %p599_p2 = scmp.lt.s32.totalorder %s60_s18, %s60_s18 }
  0x26   :  { %p595_p1 = scmp.ne.s32.totalorder %s60_s18, %s594_s19  ;;  %p600_p3 = scmp.lt.s32.totalorder %s594_s19, %s594_s19 }
  0x28   :  { %p601_p4 = por %p600_p3, %p599_p2 }
  0x2a   :  { %p602_p5 = pnand %p601_p4, %p595_p1 }
  0x2c   :  { %605 = shalt.err (!%p602_p5)
}
  0x2d   :  { %65 = dma.hbm_to_vmem [thread:$0]  %s745_s5, 1024, %s60_s18, [#allocation9], %s635_s27, %s635_s27, %s636_s28  }
  0x2e   :  { %626 = dma.done.wait [#allocation3], 128  }
  0x2f   :  { %627 = vsyncadd [#allocation3], 4294967168 }
  0x30   :  { %628 = dma.done.wait [#allocation6], 1280  }
  0x31   :  { %629 = vsyncadd [#allocation6], 4294966016 }
  0x32   :  { %630 = dma.done.wait [#allocation9], 1024  }
  0x33   :  { %631 = vsyncadd [#allocation9], 4294966272  ;;  %v640_v0 = vmov 0.0   ;;  %vm641_vm0 = vmmov 0   ;;  %v504_v1 = vld [vmem:[#allocation5 + $0x8] sm:$0xff]   ;;  %v505_v2 = vld [vmem:[#allocation5] sm:$0xff]  }
  0x34   :  { %447 = vmatprep.subr.bf16.mxu0 %v640_v0  ;;  %451 = vmatprep.mubr.msk.bf16.mxu0 %vm641_vm0, %v640_v0  ;;  %v81_v3 = vld [vmem:[#allocation2] sm:$0xff]  ;;  %v506_v4 = vld [vmem:[#allocation7 + $0x38] sm:$0xff]   ;;  %v507_v6 = vld [vmem:[#allocation7 + $0x30] sm:$0xff]   ;;  %vm106_vm1 = vcmask 261120  }
  0x35   :  { %455 = vmatprep.subr.bf16.mxu1 %v640_v0  ;;  %471 = vmatprep.mubr.msk.bf16.mxu1 %vm641_vm0, %v640_v0  ;;  %v82_v5 = vpack.c.bf16 %v81_v3, %v81_v3  ;;  %v508_v7 = vld [vmem:[#allocation7 + $0x28] sm:$0xff]   ;;  %v509_v8 = vld [vmem:[#allocation7 + $0x20] sm:$0xff]   ;;  %v510_v9 = vld [vmem:[#allocation7 + $0x18] sm:$0xff]  }
  0x36   :  { %448 = vmatpush3.bf16.msra.mxu0 %v504_v1  ;;  %456 = vmatpush3.bf16.msra.mxu1 %v506_v4  ;;  %v511_v10 = vld [vmem:[#allocation7 + $0x10] sm:$0xff]   ;;  %v512_v11 = vld [vmem:[#allocation7 + $0x8] sm:$0xff]   ;;  %v513_v12 = vld [vmem:[#allocation7] sm:$0xff]  }
  0x37   :  { %449 = vmatprep.subr.bf16.mxu0 %v640_v0  ;;  %457 = vmatprep.subr.bf16.mxu1 %v640_v0  ;;  %v514_v13 = vld [vmem:[#allocation8 + $0x38] sm:$0xff]   ;;  %v515_v14 = vld [vmem:[#allocation8 + $0x30] sm:$0xff]   ;;  %v516_v15 = vld [vmem:[#allocation8 + $0x28] sm:$0xff]  }
  0x38   :  { %v517_v16 = vld [vmem:[#allocation8 + $0x20] sm:$0xff]   ;;  %v518_v17 = vld [vmem:[#allocation8 + $0x18] sm:$0xff]   ;;  %v519_v18 = vld [vmem:[#allocation8 + $0x10] sm:$0xff]  }
  0x39   :  { %v404_v19 = vld [vmem:[%s742_s2] ss:$0 sm:$0xff]  ;;  %v521_v28 = vld [vmem:[#allocation8] sm:$0xff]  }
  0x3a   :  { %450 = vmatpush3.bf16.msra.mxu0 %v505_v2  ;;  %458 = vmatpush3.bf16.msra.mxu1 %v507_v6  ;;  %v520_v27 = vld [vmem:[#allocation8 + $0x8] sm:$0xff]  }
  0x3b   :  { %475 = vmatprep.subr.bf16.mxu0 %v640_v0  ;;  %459 = vmatprep.subr.bf16.mxu1 %v640_v0  ;;  %v408_v29 = vld [vmem:[%s744_s4] ss:$0 sm:$0xff]  ;;  %s642_s4 = smov [#allocation10]  }
  0x3c   :  { %v417_v37 = vld [vmem:[%s746_s6] ss:$0 sm:$0xff]  ;;  %s393_s24 = sshll.u32 %s642_s4, 4  ;;  %s394_s24 = int_to_ptr.vmem [resolvable:$true] %s393_s24 }
  0x3d   :  { %452 = vmatmul.mubr.msk.bf16.vlgmr.msra.gmra.mxu0 %vm106_vm1, %v82_v5  ;;  %s606_s6 = scalar_lea.vmem %s394_s24, 128  ;;  %p611_p7 = scmp.lt.s32.totalorder %s394_s24, %s394_s24 }
  0x3e   :  { %491 = vmatprep.mubr.msk.bf16.mxu0 %vm641_vm0, %v640_v0  ;;  %460 = vmatpush3.bf16.msra.mxu1 %v508_v7  ;;  %p607_p6 = scmp.ne.s32.totalorder %s394_s24, %s606_s6  ;;  %p612_p8 = scmp.lt.s32.totalorder %s606_s6, %s606_s6 }
  0x3f   :  { %461 = vmatprep.subr.bf16.mxu1 %v640_v0  ;;  %476 = vmatpush3.bf16.msra.mxu0 %v514_v13 }
  0x40   :  { %477 = vmatprep.subr.bf16.mxu0 %v640_v0  ;;  %p613_p9 = por %p612_p8, %p611_p7 }
  0x42   :  { %462 = vmatpush3.bf16.msra.mxu1 %v509_v8  ;;  %p614_p10 = pnand %p613_p9, %p607_p6 }
  0x43   :  { %463 = vmatprep.subr.bf16.mxu1 %v640_v0  ;;  %478 = vmatpush3.bf16.msra.mxu0 %v515_v14 }
  0x44   :  { %479 = vmatprep.subr.bf16.mxu0 %v640_v0 }
  0x46   :  { %464 = vmatpush3.bf16.msra.mxu1 %v510_v9 }
  0x47   :  { %465 = vmatprep.subr.bf16.mxu1 %v640_v0  ;;  %480 = vmatpush3.bf16.msra.mxu0 %v516_v15 }
  0x48   :  { %481 = vmatprep.subr.bf16.mxu0 %v640_v0 }
  0x4a   :  { %466 = vmatpush3.bf16.msra.mxu1 %v511_v10 }
  0x4b   :  { %467 = vmatprep.subr.bf16.mxu1 %v640_v0  ;;  %482 = vmatpush3.bf16.msra.mxu0 %v517_v16 }
  0x4c   :  { %483 = vmatprep.subr.bf16.mxu0 %v640_v0 }
  0x4e   :  { %468 = vmatpush3.bf16.msra.mxu1 %v512_v11 }
  0x4f   :  { %469 = vmatprep.subr.bf16.mxu1 %v640_v0  ;;  %484 = vmatpush3.bf16.msra.mxu0 %v518_v17 }
  0x50   :  { %485 = vmatprep.subr.bf16.mxu0 %v640_v0 }
  0x52   :  { %470 = vmatpush3.bf16.msra.mxu1 %v513_v12 }
  0x53   :  { %486 = vmatpush3.bf16.msra.mxu0 %v519_v18 }
  0x54   :  { %487 = vmatprep.subr.bf16.mxu0 %v640_v0 }
  0x57   :  { %488 = vmatpush3.bf16.msra.mxu0 %v520_v27 }
  0x58   :  { %489 = vmatprep.subr.bf16.mxu0 %v640_v0 }
  0x5b   :  { %490 = vmatpush3.bf16.msra.mxu0 %v521_v28 }
  0xfd   :  { %v144_v20 = vpop.f32.mrf.mxu0 }
  0xfe   :  { %v145_v21 = vadd.f32 %v404_v19, %v144_v20 }
  0xff   :  { %v453_v22 = vpop.f32.mrf.mxu0 }
 0x100   :  { %v150_v23 = vmax.f32 %v145_v21, 0.0 }
 0x101   :  { %v147_v24 = vpop.f32.mrf.mxu0 }
 0x102   :  { %v151_v25 = vpack.c.bf16 %v150_v23, %v150_v23 }
 0x103   :  { %v454_v26 = vpop.f32.mrf.mxu0 }
 0x104   :  { %472 = vmatmul.mubr.bf16.vlgmr.msra.gmra.mxu1 %v151_v25 }
 0x1c4   :  { %v257_v30 = vpop.f32.mrf.mxu1 }
 0x1c5   :  { %v258_v31 = vadd.f32 %v408_v29, %v257_v30 }
 0x1c6   :  { %v473_v32 = vpop.f32.mrf.mxu1 }
 0x1c7   :  { %v263_v33 = vmax.f32 %v258_v31, 0.0 }
 0x1c8   :  { %v260_v34 = vpop.f32.mrf.mxu1 }
 0x1c9   :  { %v264_v35 = vpack.c.bf16 %v263_v33, %v263_v33 }
 0x1ca   :  { %v474_v36 = vpop.f32.mrf.mxu1 }
 0x1cb   :  { %492 = vmatmul.mubr.bf16.vlgmr.msra.gmra.mxu0 %v264_v35 }
 0x28b   :  { %v370_v38 = vpop.f32.mrf.mxu0 }
 0x28c   :  { %v371_v39 = vadd.f32 %v417_v37, %v370_v38 }
 0x28d   :  { %v493_v40 = vpop.f32.mrf.mxu0 }
 0x28e   :  { %376 = vmax.xlane.f32.xlu0 %v371_v39 }
 0x28f   :  { %v373_v41 = vpop.f32.mrf.mxu0 }
 0x291   :  { %v494_v42 = vpop.f32.mrf.mxu0 }
 0x317   :  { %v377_v43 = vpop.xlane.xlu0 %376 }
 0x318   :  { %v378_v44 = vsub.f32 %v371_v39, %v377_v43 }
 0x31a   :  { %v379_v45 = vmul.f32 1.442695, %v378_v44 }
 0x31c   :  { %522 = vpow2.f32 %v379_v45 }
 0x329   :  { %v523_v46 = vpop.eup %522 }
 0x32a   :  { %381 = vadd.xlane.f32.xlu0 %v523_v46 }
 0x3b3   :  { %v382_v47 = vpop.xlane.xlu0 %381 }
 0x3b4   :  { %524 = vlog2.f32 %v382_v47 }
 0x3c1   :  { %v525_v48 = vpop.eup %524 }
 0x3c2   :  { %v384_v49 = vmul.f32 0.6931472, %v525_v48 }
 0x3c4   :  { %v385_v50 = vsub.f32 %v378_v44, %v384_v49 }
 0x3c6   :  { %386 = vst [vmem:[#allocation10] sm:$0xff] %v385_v50 }
 0x3c7   :  { %617 = shalt.err (!%p614_p10)
}
 0x3c8   :  { %396 = dma.vmem_to_hbm [thread:$0]  %s394_s24, 128, %s747_s7, [#allocation4]  }
 0x3c9   :  { %632 = dma.done.wait [#allocation4], 128  }
 0x3ca   :  { %633 = vsyncadd [#allocation4], 4294967168 }
 0x3cb   :  { %400 = vsyncpa [#allocation3], 1 }
 0x3cc   :  { %401 = vsyncpa [#allocation6], 1 }
 0x3cd   :  { %402 = vsyncpa [#allocation9], 1 }
 0x3ce   :  { %403 = vsyncpa [#allocation4], 1 }

</bundles_post_ra>
